<compile_context>
chip_gen: v6e
topology: v6e:2x2x1
jax: 0.10.0
libtpu: 0.0.40
codegen_flags: <defaults>
</compile_context>

<pallas_src>
import functools

import jax
import jax.numpy as jnp
from jax.experimental import pallas as pl
from jax.experimental.pallas import tpu as pltpu


# ---------------------------------------------------------------------------
# Kernels
# ---------------------------------------------------------------------------

def _se_fused_kernel(x_ref, w1_ref, b1_ref, w2_ref, b2_ref, o_ref, *, inv_hw):
    """Pool + excitation MLP + scale on a fully resident (bt, C, HW) tile.

    x_ref/o_ref: (bt, C, HW)   input / output tile (input dtype)
    w1_ref:      (C, Cse) f32  conv1 weight, right-multiply form
    b1_ref:      (1, Cse) f32
    w2_ref:      (Cse, C) f32  conv2 weight, right-multiply form
    b2_ref:      (1, C)   f32
    """
    # Per-channel spatial mean, accumulated in f32.  The tile is streamed from
    # the VMEM ref twice (sum, then multiply) - never duplicated as a value.
    sums = jnp.sum(x_ref[...], axis=-1, dtype=jnp.float32)            # (bt, C)
    mean = sums * inv_hw
    hid = jnp.dot(mean, w1_ref[...],
                  preferred_element_type=jnp.float32) + b1_ref[...]
    hid = jnp.maximum(hid, 0.0)                                        # ReLU
    gate = jnp.dot(hid, w2_ref[...],
                   preferred_element_type=jnp.float32) + b2_ref[...]
    gate = jax.nn.sigmoid(gate)                                        # (bt, C) f32
    # f32 gate, multiply promotes, cast back to the input dtype on store.
    o_ref[...] = (x_ref[...] * gate[:, :, None]).astype(o_ref.dtype)


def _pool_excite_kernel(x_ref, w1_ref, b1_ref, w2_ref, b2_ref, gate_ref,
                        acc_ref, *, inv_hw, hw, hw_t, ragged):
    """Streaming pass 1: accumulate channel sums over HW tiles; finalize with
    the SE MLP and emit a lane-dense f32 (bt, C) gate.

    x_ref:    (bt, C, hw_t)  input tile
    gate_ref: (bt, C) f32    per-channel sigmoid gate
    acc_ref:  (bt, C) f32    running spatial sum (VMEM scratch)
    """
    h = pl.program_id(1)

    @pl.when(h == 0)
    def _():
        acc_ref[...] = jnp.zeros_like(acc_ref)

    xv = x_ref[...]
    if ragged:
        # cdiv grid: mask out-of-range lanes of the tail block before summing.
        lane = jax.lax.broadcasted_iota(jnp.int32, xv.shape, xv.ndim - 1)
        valid = (h * hw_t + lane) < hw
        xv = jnp.where(valid, xv, jnp.zeros_like(xv))
    acc_ref[...] += jnp.sum(xv, axis=-1, dtype=jnp.float32)

    @pl.when(h == pl.num_programs(1) - 1)
    def _():
        mean = acc_ref[...] * inv_hw                                   # (bt, C)
        hid = jnp.dot(mean, w1_ref[...],
                      preferred_element_type=jnp.float32) + b1_ref[...]
        hid = jnp.maximum(hid, 0.0)
        gate = jnp.dot(hid, w2_ref[...],
                       preferred_element_type=jnp.float32) + b2_ref[...]
        gate_ref[...] = jax.nn.sigmoid(gate).astype(gate_ref.dtype)    # f32


def _scale_kernel(x_ref, gate_ref, o_ref):
    """Streaming pass 2: o = x * gate (f32 gate broadcast over spatial dim)."""
    o_ref[...] = (x_ref[...] * gate_ref[...][:, :, None]).astype(o_ref.dtype)


# ---------------------------------------------------------------------------
# Tiling helpers
# ---------------------------------------------------------------------------

def _largest_divisor_leq(n, cap):
    cap = max(1, min(n, int(cap)))
    for d in range(cap, 0, -1):
        if n % d == 0:
            return d
    return 1


def _pick_hw_tiling(hw, c, bt, itemsize, budget_bytes):
    """Spatial (lane) tiling for the streaming path.

    Returns (hw_t, n_hw, ragged).  hw_t is the full extent, an exact
    multiple-of-128 divisor of hw, or - if neither exists within the byte
    budget - a multiple of 128 used with a cdiv grid plus a tail mask.
    """
    row_bytes = max(1, bt * c * itemsize)
    max_lanes = max(128, budget_bytes // row_bytes)
    if hw <= max_lanes:
        return hw, 1, False                      # full extent (always legal)
    cand = (min(max_lanes, hw) // 128) * 128
    while cand >= 128:
        if hw % cand == 0:
            return cand, hw // cand, False       # exact 128-multiple divisor
        cand -= 128
    hw_t = max(128, (max_lanes // 128) * 128)    # ragged: cdiv grid + mask
    return hw_t, pl.cdiv(hw, hw_t), True


def _buffered_spec(block_shape, index_map, nbuf):
    """BlockSpec with deeper multi-buffering when the API supports it."""
    if hasattr(pl, "Buffered"):
        try:
            return pl.BlockSpec(block_shape, index_map,
                                pipeline_mode=pl.Buffered(nbuf))
        except TypeError:
            pass
    return pl.BlockSpec(block_shape, index_map)


# ---------------------------------------------------------------------------
# Wrapper
# ---------------------------------------------------------------------------

_TARGET_BLOCK_BYTES = 6 * 1024 * 1024      # per streamed buffer (two-pass path)
_FUSED_MAX_BLOCK_BYTES = 8 * 1024 * 1024   # max resident tile for the fused path
_VMEM_LIMIT_BYTES = 48 * 1024 * 1024       # fits v7x's 64 MiB physical VMEM


def se_module(x, w1, b1, w2, b2, *, donate_input=False,
              fused_max_block_bytes=_FUSED_MAX_BLOCK_BYTES,
              target_block_bytes=_TARGET_BLOCK_BYTES,
              vmem_limit_bytes=_VMEM_LIMIT_BYTES):
    """x: (B, C, H, W) NCHW. w1: (Cse, C, 1, 1), b1: (Cse,),
    w2: (C, Cse, 1, 1), b2: (C,)  -- PyTorch Conv2d parameter shapes."""
    B, C, H, W = x.shape
    Cse = w1.shape[0]
    HW = H * W
    dtype = x.dtype
    itemsize = jnp.dtype(dtype).itemsize

    x3 = x.reshape(B, C, HW)
    # Pre-transpose 1x1-conv weights to right-multiply form (glue, stays in JAX).
    w1_t = w1.reshape(Cse, C).T.astype(jnp.float32)      # (C, Cse)
    w2_t = w2.reshape(C, Cse).T.astype(jnp.float32)      # (Cse, C)
    b1_r = b1.reshape(1, Cse).astype(jnp.float32)
    b2_r = b2.reshape(1, C).astype(jnp.float32)

    bytes_per_image = C * HW * itemsize
    alias = {0: 0} if donate_input else {}

    # ------------------------------------------------------------------
    # Fused single-pass path: whole image(s) resident per grid step.
    # ------------------------------------------------------------------
    if bytes_per_image <= fused_max_block_bytes:
        bt = _largest_divisor_leq(B, max(1, fused_max_block_bytes // bytes_per_image))
        # Keep enough grid steps so both v7x TensorCores (and the pipeline)
        # have work: >=2 steps for B>=2, >=4 steps for larger batches.
        cap = B
        if B >= 2:
            cap = B // 2
        if B >= 8:
            cap = B // 4
        bt = min(bt, _largest_divisor_leq(B, cap))
        n_b = B // bt

        out = pl.pallas_call(
            functools.partial(_se_fused_kernel, inv_hw=1.0 / HW),
            out_shape=jax.ShapeDtypeStruct((B, C, HW), dtype),
            grid_spec=pltpu.PrefetchScalarGridSpec(
                num_scalar_prefetch=0,
                grid=(n_b,),
                in_specs=[
                    pl.BlockSpec((bt, C, HW), lambda b: (b, 0, 0)),
                    pl.BlockSpec((C, Cse), lambda b: (0, 0)),
                    pl.BlockSpec((1, Cse), lambda b: (0, 0)),
                    pl.BlockSpec((Cse, C), lambda b: (0, 0)),
                    pl.BlockSpec((1, C), lambda b: (0, 0)),
                ],
                out_specs=pl.BlockSpec((bt, C, HW), lambda b: (b, 0, 0)),
            ),
            compiler_params=pltpu.CompilerParams(
                dimension_semantics=("parallel",),
                vmem_limit_bytes=vmem_limit_bytes),
            input_output_aliases=alias,
        )(x3, w1_t, b1_r, w2_t, b2_r)
        return out.reshape(B, C, H, W)

    # ------------------------------------------------------------------
    # Two-pass streaming path: images too large to hold per step.
    # ------------------------------------------------------------------
    bt = 1
    hw_t, n_hw, ragged = _pick_hw_tiling(HW, C, bt, itemsize, target_block_bytes)
    n_b = B // bt

    # ---- pass 1: pool + excitation MLP -> lane-dense f32 gate (B, C) -------
    gate = pl.pallas_call(
        functools.partial(_pool_excite_kernel, inv_hw=1.0 / HW,
                          hw=HW, hw_t=hw_t, ragged=ragged),
        out_shape=jax.ShapeDtypeStruct((B, C), jnp.float32),
        grid_spec=pltpu.PrefetchScalarGridSpec(
            num_scalar_prefetch=0,
            grid=(n_b, n_hw),
            in_specs=[
                # DMA-bound pass: 3-deep buffering hides DMA jitter and the
                # MLP-epilogue bubble at the last HW step.
                _buffered_spec((bt, C, hw_t), lambda b, h: (b, 0, h), 3),
                pl.BlockSpec((C, Cse), lambda b, h: (0, 0)),
                pl.BlockSpec((1, Cse), lambda b, h: (0, 0)),
                pl.BlockSpec((Cse, C), lambda b, h: (0, 0)),
                pl.BlockSpec((1, C), lambda b, h: (0, 0)),
            ],
            out_specs=pl.BlockSpec((bt, C), lambda b, h: (b, 0)),
            scratch_shapes=[pltpu.VMEM((bt, C), jnp.float32)],
        ),
        compiler_params=pltpu.CompilerParams(
            dimension_semantics=("parallel", "arbitrary"),
            vmem_limit_bytes=vmem_limit_bytes),
    )(x3, w1_t, b1_r, w2_t, b2_r)

    # ---- pass 2: scale x by the gate (pure streaming) ----------------------
    out = pl.pallas_call(
        _scale_kernel,
        out_shape=jax.ShapeDtypeStruct((B, C, HW), dtype),
        grid_spec=pltpu.PrefetchScalarGridSpec(
            num_scalar_prefetch=0,
            grid=(n_b, n_hw),
            in_specs=[
                pl.BlockSpec((bt, C, hw_t), lambda b, h: (b, 0, h)),
                pl.BlockSpec((bt, C), lambda b, h: (b, 0)),
            ],
            out_specs=pl.BlockSpec((bt, C, hw_t), lambda b, h: (b, 0, h)),
        ),
        compiler_params=pltpu.CompilerParams(
            dimension_semantics=("parallel", "parallel"),
            vmem_limit_bytes=vmem_limit_bytes),
        input_output_aliases=alias,
    )(x3, gate)

    return out.reshape(B, C, H, W)


# ---------------------------------------------------------------------------
# Pure-JAX reference and self-test
# ---------------------------------------------------------------------------

def se_ref(x, w1, b1, w2, b2):
    """Pure-JAX reference of the PyTorch forward."""
    B, C, H, W = x.shape
    Cse = w1.shape[0]
    y = jnp.mean(x, axis=(2, 3))                             # (B, C)
    h = jnp.maximum(y @ w1.reshape(Cse, C).T + b1, 0.0)      # (B, Cse)
    s = jax.nn.sigmoid(h @ w2.reshape(C, Cse).T + b2)        # (B, C)
    return x * s[:, :, None, None]


if __name__ == "__main__":
    def _check(B, C, Cse, H, W, **kw):
        key = jax.random.PRNGKey(0)
        kx, k1, k2, k3, k4 = jax.random.split(key, 5)
        x = jax.random.normal(kx, (B, C, H, W), dtype=jnp.float32)
        w1 = jax.random.normal(k1, (Cse, C, 1, 1), dtype=jnp.float32) * 0.1
        b1 = jax.random.normal(k2, (Cse,), dtype=jnp.float32) * 0.1
        w2 = jax.random.normal(k3, (C, Cse, 1, 1), dtype=jnp.float32) * 0.1
        b2 = jax.random.normal(k4, (C,), dtype=jnp.float32) * 0.1
        out = jax.block_until_ready(se_module(x, w1, b1, w2, b2, **kw))
        ref = se_ref(x, w1, b1, w2, b2)
        assert out.shape == (B, C, H, W)
        assert jnp.allclose(out, ref, atol=1e-5, rtol=1e-5), (B, C, H, W, kw)

    # Fused single-pass path (image fits the VMEM budget).
    _check(2, 8, 2, 16, 16)
    # Streaming two-pass path with 128-aligned spatial tiles (forced via tiny budgets).
    _check(2, 8, 2, 16, 16, fused_max_block_bytes=0, target_block_bytes=4096)
    # Streaming two-pass path with a ragged spatial extent (cdiv grid + tail mask).
    _check(2, 8, 2, 15, 15, fused_max_block_bytes=0, target_block_bytes=4096)

    print("KERNEL_OK")
</pallas_src>

<mosaic_0001>
module attributes {stable_mosaic.version = 11 : i64} {
  func.func @_se_fused_kernel(%arg0: i32, %arg1: memref<1x8x256xf32, #tpu.memory_space<vmem>>, %arg2: memref<8x2xf32, #tpu.memory_space<vmem>>, %arg3: memref<1x2xf32, #tpu.memory_space<vmem>>, %arg4: memref<2x8xf32, #tpu.memory_space<vmem>>, %arg5: memref<1x8xf32, #tpu.memory_space<vmem>>, %arg6: memref<1x8x256xf32, #tpu.memory_space<vmem>>) attributes {dimension_semantics = [#tpu.dimension_semantics<parallel>], iteration_bounds = array<i64: 2>, scalar_prefetch = 0 : i64, scratch_operands = 0 : i64, tpu.core_type = #tpu.core_type<tc>, window_params = [{transform_indices = @transform_0, window_bounds = array<i64: 1, 8, 256>}, {pipeline_mode = #tpu.pipeline_mode<synchronous>, transform_indices = @transform_1, window_bounds = array<i64: 8, 2>}, {pipeline_mode = #tpu.pipeline_mode<synchronous>, transform_indices = @transform_2, window_bounds = array<i64: 1, 2>}, {pipeline_mode = #tpu.pipeline_mode<synchronous>, transform_indices = @transform_3, window_bounds = array<i64: 2, 8>}, {pipeline_mode = #tpu.pipeline_mode<synchronous>, transform_indices = @transform_4, window_bounds = array<i64: 1, 8>}, {transform_indices = @transform_5, window_bounds = array<i64: 1, 8, 256>}]} {
    %c0 = arith.constant 0 : index
    %c0_0 = arith.constant 0 : index
    %c0_1 = arith.constant 0 : index
    %0 = vector.load %arg1[%c0, %c0_0, %c0_1] : memref<1x8x256xf32, #tpu.memory_space<vmem>>, vector<1x8x256xf32>
    %cst = arith.constant dense<0.000000e+00> : vector<1x8xf32>
    %1 = vector.multi_reduction <add>, %0, %cst [2] : vector<1x8x256xf32> to vector<1x8xf32>
    %cst_2 = arith.constant 3.906250e-03 : f32
    %2 = vector.broadcast %cst_2 : f32 to vector<1x8xf32>
    %3 = arith.mulf %1, %2 : vector<1x8xf32>
    %c0_3 = arith.constant 0 : index
    %c0_4 = arith.constant 0 : index
    %4 = vector.load %arg2[%c0_3, %c0_4] : memref<8x2xf32, #tpu.memory_space<vmem>>, vector<8x2xf32>
    %cst_5 = arith.constant dense<0.000000e+00> : vector<1x2xf32>
    %5 = tpu.matmul %3, %4, %cst_5 {dimension_numbers = #tpu.dot_dimension_numbers<[1], [0], [0], [1], [0, 0, 1, 1], [], []>} : vector<1x8xf32>, vector<8x2xf32>, vector<1x2xf32> -> vector<1x2xf32>
    %c0_6 = arith.constant 0 : index
    %c0_7 = arith.constant 0 : index
    %6 = vector.load %arg3[%c0_6, %c0_7] : memref<1x2xf32, #tpu.memory_space<vmem>>, vector<1x2xf32>
    %7 = arith.addf %5, %6 : vector<1x2xf32>
    %cst_8 = arith.constant 0.000000e+00 : f32
    %8 = vector.broadcast %cst_8 : f32 to vector<1x2xf32>
    %9 = arith.maximumf %7, %8 : vector<1x2xf32>
    %c0_9 = arith.constant 0 : index
    %c0_10 = arith.constant 0 : index
    %10 = vector.load %arg4[%c0_9, %c0_10] : memref<2x8xf32, #tpu.memory_space<vmem>>, vector<2x8xf32>
    %cst_11 = arith.constant dense<0.000000e+00> : vector<1x8xf32>
    %11 = tpu.matmul %9, %10, %cst_11 {dimension_numbers = #tpu.dot_dimension_numbers<[1], [0], [0], [1], [0, 0, 1, 1], [], []>} : vector<1x2xf32>, vector<2x8xf32>, vector<1x8xf32> -> vector<1x8xf32>
    %c0_12 = arith.constant 0 : index
    %c0_13 = arith.constant 0 : index
    %12 = vector.load %arg5[%c0_12, %c0_13] : memref<1x8xf32, #tpu.memory_space<vmem>>, vector<1x8xf32>
    %13 = arith.addf %11, %12 : vector<1x8xf32>
    %14 = arith.negf %13 : vector<1x8xf32>
    %15 = math.exp %14 : vector<1x8xf32>
    %cst_14 = arith.constant 1.000000e+00 : f32
    %16 = vector.broadcast %cst_14 : f32 to vector<1x8xf32>
    %17 = arith.addf %16, %15 : vector<1x8xf32>
    %18 = arith.divf %16, %17 : vector<1x8xf32>
    %c0_15 = arith.constant 0 : index
    %c0_16 = arith.constant 0 : index
    %c0_17 = arith.constant 0 : index
    %19 = vector.load %arg1[%c0_15, %c0_16, %c0_17] : memref<1x8x256xf32, #tpu.memory_space<vmem>>, vector<1x8x256xf32>
    %20 = vector.shape_cast %18 : vector<1x8xf32> to vector<1x8x1xf32>
    %21 = vector.broadcast %20 : vector<1x8x1xf32> to vector<1x8x256xf32>
    %22 = arith.mulf %19, %21 : vector<1x8x256xf32>
    %c0_18 = arith.constant 0 : index
    %c0_19 = arith.constant 0 : index
    %c0_20 = arith.constant 0 : index
    %23 = vector.load %arg6[%c0_18, %c0_19, %c0_20] : memref<1x8x256xf32, #tpu.memory_space<vmem>>, vector<1x8x256xf32>
    tpu.vector_store %arg6[%c0_18, %c0_19, %c0_20], %22 {strides = array<i32>} : memref<1x8x256xf32, #tpu.memory_space<vmem>>, vector<1x8x256xf32>,
    return
  }
  func.func @transform_0(%arg0: i32) -> (i32, i32, i32) {
    %c0_i32 = arith.constant 0 : i32
    %c0_i32_0 = arith.constant 0 : i32
    %c0_i32_1 = arith.constant 0 : i32
    return %arg0, %c0_i32, %c0_i32_0 : i32, i32, i32
  }
  func.func @transform_1(%arg0: i32) -> (i32, i32) {
    %c0_i32 = arith.constant 0 : i32
    %c0_i32_0 = arith.constant 0 : i32
    %c0_i32_1 = arith.constant 0 : i32
    return %c0_i32, %c0_i32_0 : i32, i32
  }
  func.func @transform_2(%arg0: i32) -> (i32, i32) {
    %c0_i32 = arith.constant 0 : i32
    %c0_i32_0 = arith.constant 0 : i32
    %c0_i32_1 = arith.constant 0 : i32
    return %c0_i32, %c0_i32_0 : i32, i32
  }
  func.func @transform_3(%arg0: i32) -> (i32, i32) {
    %c0_i32 = arith.constant 0 : i32
    %c0_i32_0 = arith.constant 0 : i32
    %c0_i32_1 = arith.constant 0 : i32
    return %c0_i32, %c0_i32_0 : i32, i32
  }
  func.func @transform_4(%arg0: i32) -> (i32, i32) {
    %c0_i32 = arith.constant 0 : i32
    %c0_i32_0 = arith.constant 0 : i32
    %c0_i32_1 = arith.constant 0 : i32
    return %c0_i32, %c0_i32_0 : i32, i32
  }
  func.func @transform_5(%arg0: i32) -> (i32, i32, i32) {
    %c0_i32 = arith.constant 0 : i32
    %c0_i32_0 = arith.constant 0 : i32
    %c0_i32_1 = arith.constant 0 : i32
    return %arg0, %c0_i32, %c0_i32_0 : i32, i32, i32
  }
}

</mosaic_0001>

<bundles_post_ra>
// kernel: tpu_custom_call.1
= control target key start
LH: loop header
LB: loop body
LE: loop exit
PB: predicated region body
PF: predicated region fallthrough
CT: control target
= control target key end

     0   :  { %10 = vsyncpa [#allocation3], 0  ;;  %s889_s0 = inlined_call_operand.hbm [shape: f32[2,8,256], index: 0, kind: input, shape index: {}]   ;;  %s890_s1 = inlined_call_operand.vmem [shape: f32[8,2], index: 1, kind: input, shape index: {}]   ;;  %s891_s2 = inlined_call_operand.vmem [shape: f32[1,2], index: 2, kind: input, shape index: {}]   ;;  %s892_s3 = inlined_call_operand.vmem [shape: f32[2,8], index: 3, kind: input, shape index: {}]   ;;  %s893_s4 = inlined_call_operand.vmem [shape: f32[1,8], index: 4, kind: input, shape index: {}]   ;;  %s894_s5 = inlined_call_operand.hbm [shape: f32[2,8,256], index: 5, kind: output, shape index: {}]  }
   0x1   :  { %12 = vsyncpa [#allocation3 + $0x1], 0 }
   0x2   :  { %13 = vsyncpa [#allocation4], 0 }
   0x3   :  { %15 = vsyncpa [#allocation4 + $0x1], 0  ;;  %s726_s18 = smov 0   ;;  %s728_s19 = smov 0  }
   0x4   :  { %s730_s20 = smov 0   ;;  %s732_s21 = smov 0  }
   0x5 LB: > { %s747_s22 = sadd.s32 4294967295, %s690_s21   ;;  %s512_s23 = sadd.s32 4294967294, %s690_s21   ;;  %s690_s21 = sphi %s732_s21, %s911_s21   ;;  %s686_s20 = sphi %s730_s20, %s910_s20   ;;  %s682_s19 = sphi %s728_s19, %s909_s19   ;;  %s678_s18 = sphi %s726_s18, %s908_s18  }
   0x6   : > { %s751_s24 = sadd.s32 1, %s690_s21   ;;  %s28_s25 = sadd.s32 1, %s686_s20 }
   0x7   : > { %s25_s26 = ssub.s32 %s690_s21, %s751_s24  ;;  %p35_p0 = scmp.ne.s32.totalorder %s686_s20, %s682_s19 }
   0x8   : > { %p26_p1 = scmp.eq.s32.totalorder %s25_s26, 0  ;;  %p36_p2 = scmp.eq.s32.totalorder %s690_s21, 0 }
   0x9   : > { %p41_p3 = scmp.ne.s32.totalorder %s682_s19, %s678_s18  ;;  %p42_p4 = scmp.eq.s32.totalorder %s747_s22, 0 }
   0xa   : > { %s763_s27 = scalar_select %p26_p1, %s686_s20, %s28_s25  }
   0xb   : > { %p765_p5 = por %p36_p2, %p35_p0  ;;  %p769_p6 = por %p42_p4, %p41_p3 }
   0xc   : > { %p149_p7 = scmp.eq.s32.totalorder %s747_s22, 1  ;;  %p155_p8 = scmp.eq.s32.totalorder %s512_s23, 1 }
   0xd   : > { %s898_s29 = scalar_select %p769_p6, 1, 0 }
   0xe   : > { %p558_p10 = scmp.lt.s32.totalorder %s690_s21, 2  ;;  %p776_p11 = por %p149_p7, %p35_p0 }
   0xf   : > { %p780_p12 = por %p155_p8, %p41_p3  ;;  %s187_s7 = sand.u32 1, %s686_s20  }
  0x10   : > { %s899_s30 = scalar_select %p776_p11, 1, 0 }
  0x11   : > { %s900_s6 = scalar_select %p780_p12, 1, 0 }
  0x12   : > { %s530_s8 = sshll.u32 %s690_s21, 8  ;;  %s515_s9 = sshll.u32 %s187_s7, 4 }
  0x13   : > { %s789_s12 = scalar_lea.hbm %s889_s0, %s530_s8  ;;  %s191_s13 = scalar_lea.vmem [#allocation2], %s515_s9 }
  0x14   : > { %s199_s14 = sshll.u32 %s191_s13, 4  ;;  %p793_p13 = pnand %p558_p10, %p765_p5  ;;  %s797_s14 = int_to_ptr.vmem [resolvable:$true] %s199_s14 }
  0x15   : > { %s188_s16 = scalar_lea.sflag [#allocation3], %s187_s7  ;;  %s598_s17 = scalar_lea.hbm %s789_s12, 256 }
  0x16   : > { %p599_p2 = scmp.ne.s32.totalorder %s789_s12, %s598_s17  ;;  %p600_p3 = pneg %p793_p13 }
  0x17   : > { %s603_s26 = scalar_lea.hbm %s889_s0, 512  ;;  %p604_p5 = scmp.lt.s32.totalorder %s789_s12, %s889_s0 }
  0x18   : > { %p601_p4 = pnand %p600_p3, %p599_p2  ;;  %p605_p8 = scmp.lt.s32.totalorder %s603_s26, %s598_s17 }
  0x1a   : > { %p602_p7 = pneg %p601_p4  ;;  %p606_p10 = por %p605_p8, %p604_p5 }
  0x1c   : > { %p607_p9 = pnand %p606_p10, %p602_p7 }
  0x1e   : > { %610 = shalt.err (!%p607_p9)
}
  0x1f   : > { %s611_s7 = scalar_lea.vmem %s797_s14, 256  ;;  %s692_s9 = smov [#allocation2]  }
  0x20   : > { %p612_p0 = scmp.ne.s32.totalorder %s797_s14, %s611_s7  ;;  %s616_s10 = sshll.u32 %s692_s9, 4  ;;  %s617_s10 = int_to_ptr.vmem [resolvable:$false] %s616_s10 }
  0x21   : > { %s618_s11 = scalar_lea.vmem %s617_s10, 512  ;;  %p619_p4 = scmp.lt.s32.totalorder %s797_s14, %s617_s10 }
  0x22   : > { %p614_p1 = pnand %p612_p0, %p600_p3  ;;  %p620_p12 = scmp.lt.s32.totalorder %s618_s11, %s611_s7 }
  0x24   : > { %p615_p2 = pneg %p614_p1  ;;  %p621_p11 = por %p620_p12, %p619_p4 }
  0x26   : > { %p622_p6 = pnand %p621_p11, %p615_p2 }
  0x28   : > { %625 = shalt.err (!%p622_p6)
}
  0x29   : > { %553 = dma.hbm_to_vmem [thread:$0]  (!%p793_p13), %s789_s12, 256, %s797_s14, %s188_s16  }
  0x2a   : > { %p902_p9 = scmp.lt.s32.totalorder %s690_s21, 3  ;;  %p903_p7 = scmp.ge.s32.totalorder %s690_s21, 1 }
  0x2c   : > { %p205_p0 = pnand %p903_p7, %p902_p9 }
  0x2d   : > { %s824_s13 = sand.u32 (!%p205_p0), 1, %s682_s19   ;;  %p904_p6 = scmp.ne.s32.totalorder (!%p205_p0), %s898_s29, 0 }
  0x2e   : > { %208 = sbr.rel (%p205_p0) target bundleno = 753 (0x2f1), region = 40  ;;  %s519_s17 = sshll.u32 (!%p205_p0), %s824_s13, 4 }
  0x2f   : > { %s211_s23 = scalar_lea.sflag (!%p205_p0), [#allocation3], %s824_s13  ;;  %s214_s15 = scalar_lea.vmem (!%p205_p0), [#allocation2], %s519_s17 }
  0x33   : > { %669 = dma.done.wait (%p904_p6), %s211_s23, 256  }
  0x34   : > { %671 = vsyncadd (%p904_p6), %s211_s23, 4294967040  ;;  %v241_v0 = vld [vmem:[%s214_s15] sm:$0xff]  ;;  %v242_v1 = vld [vmem:[%s214_s15 + $0x8] sm:$0xff]  ;;  %v693_v3 = vmov 0.0   ;;  %vm694_vm0 = vmmov 0   ;;  %v250_v5 = vlaneseq  ;;  %vm256_vm1 = vcmask 64512  }
  0x35   : > { %v243_v2 = vadd.f32 %v242_v1, %v241_v0  ;;  %536 = vmatprep.subr.mxu0 %v693_v3  ;;  %v247_v4 = vld [vmem:[%s890_s1] sm:$0xff]  ;;  %541 = vmatprep.subr.mxu1 %v693_v3  ;;  %vm336_vm2 = vcmask 1041408   ;;  %vm332_vm3 = vcmask 15360   ;;  %s531_s7 = sshll.u32 %s747_s22, 8  ;;  %s240_s9 = scalar_lea.vmem [#allocation5], %s519_s17 }
  0x36   : > { %537 = vmatpush3.msra.mxu0 %v247_v4  ;;  %538 = vmatprep.mubr.msk.f32.mxu0 %vm694_vm0, %v693_v3  ;;  %v251_v6 = vand.u32 127, %v250_v5  ;;  %v253_v7 = vshrl.u32 %v250_v5, 7  ;;  %v330_v12 = vld [vmem:[%s892_s3] sm:$0x3]  ;;  %s442_s10 = sshll.u32 %s240_s9, 4  ;;  %s852_s15 = scalar_lea.hbm %s894_s5, %s531_s7  ;;  %s443_s10 = int_to_ptr.vmem [resolvable:$true] %s442_s10 }
  0x37   : > { %244 = vadd.xlane.f32.xlu0 %v243_v2  ;;  %543 = vmatprep.mubr.msk.f32.mxu1 %vm694_vm0, %v693_v3  ;;  %v248_v13 = vld [vmem:[%s891_s2] sm:$0x1]  ;;  %s428_s12 = scalar_lea.sflag [#allocation4], %s824_s13  ;;  %s626_s14 = scalar_lea.vmem %s443_s10, 256 }
  0x38   : > { %v254_v8 = vsub.s32 %v251_v6, %v253_v7  ;;  %542 = vmatpush3.msk.msra.mxu1 %vm336_vm2, %v330_v12  ;;  %v331_v18 = vld [vmem:[%s893_s4] sm:$0x1]  ;;  %v418_v25 = vsub.s32 0, %v253_v7  ;;  %p627_p11 = scmp.ne.s32.totalorder %s443_s10, %s626_s14  ;;  %p905_p12 = scmp.ne.s32.totalorder %s899_s30, 0 }
  0x39   : > { %s695_s22 = smov [#allocation5]  }
  0x3a   : > { %p628_p13 = pnand %p627_p11, %p905_p12  ;;  %s630_s17 = sshll.u32 %s695_s22, 4  ;;  %s631_s17 = int_to_ptr.vmem [resolvable:$false] %s630_s17 }
  0x3b   : > { %s632_s29 = scalar_lea.vmem %s631_s17, 512  ;;  %p633_p3 = scmp.lt.s32.totalorder %s443_s10, %s631_s17 }
  0x3c   : > { %p629_p1 = pneg %p628_p13  ;;  %p634_p5 = scmp.lt.s32.totalorder %s632_s29, %s626_s14 }
  0x3e   : > { %p635_p8 = por %p634_p5, %p633_p3 }
  0x40   : > { %p636_p10 = pnand %p635_p8, %p629_p1 }
  0xc0   : > { %v245_v9 = vpop.xlane.xlu0 %244 }
  0xc1   : > { %v246_v10 = vmul.f32 0.00390625, %v245_v9 }
  0xc3   : > { %v255_v11 = vrot.slane %v246_v10, %v254_v8 }
  0xc5   : > { %539 = vmatmul.mubr.msk.f32.vlgmr.msra.gmra.mxu0 %vm256_vm1, %v255_v11 }
 0x185   : > { %v325_v14 = vpop.f32.mrf.mxu0 }
 0x186   : > { %v326_v15 = vadd.f32 %v325_v14, %v248_v13 }
 0x187   : > { %v540_v16 = vpop.f32.mrf.mxu0 }
 0x188   : > { %v329_v17 = vmax.f32 %v326_v15, 0.0 }
 0x18a   : > { %544 = vmatmul.mubr.msk.f32.vlgmr.msra.gmra.mxu1 %vm332_vm3, %v329_v17 }
 0x24a   : > { %v406_v19 = vpop.f32.mrf.mxu1 }
 0x24b   : > { %v407_v20 = vadd.f32 %v406_v19, %v331_v18 }
 0x24c   : > { %v545_v21 = vpop.f32.mrf.mxu1 }
 0x24d   : > { %v524_v22 = vmul.f32 -1.442695, %v407_v20 }
 0x24f   : > { %594 = vpow2.f32 %v524_v22 }
 0x25c   : > { %v595_v23 = vpop.eup %594 }
 0x25d   : > { %v413_v24 = vadd.f32 1.0, %v595_v23 }
 0x25f   : > { %596 = vrcp.f32 %v413_v24 }
 0x26c   : > { %v597_v26 = vpop.eup %596 }
 0x26d   : > { %v419_v27 = vrot.slane %v597_v26, %v418_v25 }
 0x26f   : > { %421 = vbcast.lane.b32.xlu0 %v419_v27, 256 }
 0x2e1   : > { %v422_v28 = vpop.permute.xlu0 %421 }
 0x2e2   : > { %v423_v29 = vmul.f32 %v422_v28, %v241_v0  ;;  %v424_v30 = vmul.f32 %v422_v28, %v242_v1 }
 0x2e4   : > { %425 = vst [vmem:[%s240_s9] sm:$0xff] %v423_v29  ;;  %426 = vst [vmem:[%s240_s9 + $0x8] sm:$0xff] %v424_v30 }
 0x2e5   : > { %639 = shalt.err (!%p636_p10)
}
 0x2e6   : > { %s640_s16 = scalar_lea.hbm %s852_s15, 256  ;;  %s644_s26 = scalar_lea.hbm %s894_s5, 512 }
 0x2e7   : > { %p641_p2 = scmp.ne.s32.totalorder %s852_s15, %s640_s16  ;;  %p645_p7 = scmp.lt.s32.totalorder %s852_s15, %s894_s5 }
 0x2e8   : > { %p646_p0 = scmp.lt.s32.totalorder %s644_s26, %s640_s16 }
 0x2e9   : > { %p642_p4 = pnand %p641_p2, %p905_p12 }
 0x2ea   : > { %p647_p6 = por %p646_p0, %p645_p7 }
 0x2eb   : > { %p643_p9 = pneg %p642_p4 }
 0x2ed   : > { %p648_p11 = pnand %p647_p6, %p643_p9 }
 0x2ef   : > { %651 = shalt.err (!%p648_p11)
}
 0x2f0   : > { %548 = dma.vmem_to_hbm [thread:$0]  (%p905_p12), %s443_s10, 256, %s852_s15, %s428_s12  }
 0x2f1 PF: > { %s454_s7 = sand.u32 1, %s678_s18   ;;  %p906_p13 = scmp.ne.s32.totalorder %s900_s6, 0 }
 0x2f2   : > { %p907_p1 = scmp.ge.s32.totalorder %s690_s21, 2  ;;  %s455_s9 = scalar_lea.sflag [#allocation4], %s454_s7 }
 0x2f4   : > { %p555_p3 = pnand %p907_p1, %p906_p13 }
 0x2f6   : > { %p556_p5 = pneg %p555_p3 }
 0x2f8   : > { %673 = dma.done.wait (%p556_p5), %s455_s9, 256  }
 0x2f9   : > { %675 = vsyncadd (%p556_p5), %s455_s9, 4294967040  ;;  %p18_p8 = scmp.ge.s32.totalorder %s751_s24, 4   ;;  %s908_s18 = smov %s682_s19 }
 0x2fa   : > { %s909_s19 = smov %s686_s20  ;;  %s910_s20 = smov %s763_s27 }
 0x2fb   : > { %s911_s21 = smov %s751_s24  ;;  %20 = sbr.rel (!%p18_p8) target bundleno = 5 (0x5), region = 85 }
 0x300   :  { %460 = vsyncpa [#allocation3], 1 }
 0x301   :  { %462 = vsyncpa [#allocation3 + $0x1], 1 }
 0x302   :  { %463 = vsyncpa [#allocation4], 1 }
 0x303   :  { %465 = vsyncpa [#allocation4 + $0x1], 1 }

</bundles_post_ra>
